<compile_context>
chip_gen: v7x
topology: tpu7x:2x2x1
jax: 0.10.0
libtpu: 0.0.40
codegen_flags: <defaults>
</compile_context>

<pallas_src>
import functools
import math

import jax
import jax.numpy as jnp
from jax.experimental import pallas as pl
from jax.experimental.pallas import tpu as pltpu


def _round_up(x: int, m: int) -> int:
    return ((x + m - 1) // m) * m


def _rope_inv_freq(rotary_dim: int, rotary_base: int = 10000):
    # Mirrors nn.Module.__init__ (plain JAX glue, deterministic).
    return 1.0 / (
        rotary_base
        ** (jnp.arange(0, rotary_dim, 2, dtype=jnp.float32) / rotary_dim)
    )


def _build_rotary_table(rotary_dim, rotary_base=10000, max_position=16384):
    # Reference table, identical to the PyTorch module's frozen embedding.
    inv_freq = _rope_inv_freq(rotary_dim, rotary_base)
    t = jnp.arange(max_position, dtype=jnp.float32)
    freqs = jnp.einsum("i,j->ij", t, inv_freq)
    return jnp.concatenate([jnp.sin(freqs), jnp.cos(freqs)], axis=-1)


def _rope_kernel(ids_ref, w_ref, phase_ref, out_ref, *, k: int):
    # ids_ref:   (R, k)       int32  -- k position ids folded per output row
    # w_ref:     (k, k*D)     f32    -- W[g, g*D+d] = inv_freq[d % half], else 0
    # phase_ref: (1, k*D)     f32    -- 0 on sin lanes, pi/2 on cos lanes
    # out_ref:   (R, k*D)            -- lane-dense output tile
    pos = ids_ref[...].astype(jnp.float32)                  # (R, k)
    # angles[r, g*D+d] = pos[r, g] * inv_freq2[d]   (exact: other terms are *0)
    ang = pos[:, 0:1] * w_ref[0:1, :]
    for g in range(1, k):                                    # unrolled, k small
        ang = ang + pos[:, g:g + 1] * w_ref[g:g + 1, :]
    # cos(x) = sin(x + pi/2): one EUP transcendental per element, dense store.
    out_ref[...] = jnp.sin(ang + phase_ref[...]).astype(out_ref.dtype)


def fixed_rotary_positional_embedding(
    position_ids,
    rotary_dim: int,
    rotary_base: int = 10000,
    max_position: int = 16384,
    out_dtype=jnp.float32,
):
    """Forward pass of FixedRotaryPositionalEmbedding as a Pallas TPU kernel.

    position_ids: integer array of any shape.  Returns
    position_ids.shape + (rotary_dim,), dtype `out_dtype` (f32 default,
    matching the torch module).
    """
    assert rotary_dim % 2 == 0
    half = rotary_dim // 2

    orig_shape = position_ids.shape
    # Clamp ids like a safe embedding lookup.  NOTE: differs from PyTorch,
    # which would return garbage / fault on out-of-range ids.
    ids_flat = jnp.clip(
        position_ids.reshape(-1).astype(jnp.int32), 0, max_position - 1
    )
    n = ids_flat.shape[0]

    # ---- lane folding: k tokens per 128-lane output row -------------------
    if rotary_dim <= 128 and 128 % rotary_dim == 0:
        k = 128 // rotary_dim
    else:
        k = 1
    fold_dim = k * rotary_dim

    n_tok = _round_up(n, k)
    if n_tok != n:
        ids_flat = jnp.pad(ids_flat, (0, n_tok - n))
    rows = n_tok // k
    ids_2d = ids_flat.reshape(rows, k)          # contiguous; full last dim/block

    # ---- tiny resident constants ------------------------------------------
    inv_freq = _rope_inv_freq(rotary_dim, rotary_base)          # (half,)
    inv_freq2 = jnp.concatenate([inv_freq, inv_freq])           # (rotary_dim,)
    # Folded angular-rate matrix: W[g, g*D + d] = inv_freq2[d], else 0.
    w = (jnp.eye(k, dtype=jnp.float32)[:, :, None]
         * inv_freq2[None, None, :]).reshape(k, fold_dim)
    phase = jnp.concatenate(
        [jnp.zeros((half,), jnp.float32),
         jnp.full((half,), jnp.float32(math.pi / 2))]
    )
    phase_fold = jnp.tile(phase, (k,)).reshape(1, fold_dim)

    # ---- tile sizing --------------------------------------------------------
    itemsize = jnp.dtype(out_dtype).itemsize
    sub = 16 if jnp.dtype(out_dtype) == jnp.dtype(jnp.bfloat16) else 8
    # Target ~2 MiB of output per grid step (amortizes per-step overhead);
    # VMEM (double-buffered ids + out) stays well under the 32 MiB scoped
    # default on v5e/v6e/v7x at this size.
    bytes_per_row = max(fold_dim, 128) * itemsize
    tile_rows = _round_up(max((2 << 20) // bytes_per_row, sub), sub)
    # Keep >= 2 grid steps when there are enough rows so ("parallel",) actually
    # feeds both TensorCores on v7x.
    tile_rows = min(tile_rows, _round_up(max(pl.cdiv(rows, 2), 1), sub))
    tile_rows = max(tile_rows, sub)
    grid = (pl.cdiv(rows, tile_rows),)

    cost = pl.CostEstimate(
        flops=(2 * k + 1) * rows * fold_dim,
        transcendentals=rows * fold_dim,
        bytes_accessed=rows * k * 4 + (k + 1) * fold_dim * 4
        + rows * fold_dim * itemsize,
    )

    out_fold = pl.pallas_call(
        functools.partial(_rope_kernel, k=k),
        out_shape=jax.ShapeDtypeStruct((rows, fold_dim), out_dtype),
        grid_spec=pltpu.PrefetchScalarGridSpec(
            num_scalar_prefetch=0,
            grid=grid,
            in_specs=[
                # Per-tile ids: contiguous HBM burst, pipelined with the output.
                pl.BlockSpec((tile_rows, k), lambda t: (t, 0)),
                # Tiny constants, same block every step -> VMEM-resident.
                pl.BlockSpec((k, fold_dim), lambda t: (0, 0)),
                pl.BlockSpec((1, fold_dim), lambda t: (0, 0)),
            ],
            out_specs=pl.BlockSpec((tile_rows, fold_dim), lambda t: (t, 0)),
        ),
        compiler_params=pltpu.CompilerParams(
            dimension_semantics=("parallel",),   # independent tiles
        ),
        cost_estimate=cost,
    )(ids_2d, w, phase_fold)

    # Row-major un-fold: free metadata reshape.  The [:n] slice (a copy) only
    # happens when n is not a multiple of k.
    out_flat = out_fold.reshape(n_tok, rotary_dim)
    if n_tok != n:
        out_flat = out_flat[:n]
    return out_flat.reshape(*orig_shape, rotary_dim)


if __name__ == "__main__":
    rotary_dim = 32
    rotary_base = 10000
    max_position = 128
    batch, seq = 2, 8

    key = jax.random.PRNGKey(0)
    position_ids = jax.random.randint(
        key, (batch, seq), 0, max_position, dtype=jnp.int32
    )

    out = fixed_rotary_positional_embedding(
        position_ids,
        rotary_dim=rotary_dim,
        rotary_base=rotary_base,
        max_position=max_position,
    )
    out = jax.block_until_ready(out)

    # Pure-JAX reference: the frozen table lookup, exactly as the torch module.
    table = _build_rotary_table(rotary_dim, rotary_base, max_position)
    ref = jnp.take(table, position_ids.reshape(-1), axis=0).reshape(
        batch, seq, rotary_dim
    )

    assert out.shape == (batch, seq, rotary_dim)
    assert out.dtype == jnp.float32
    # cos(x)=sin(x+pi/2) and EUP-vs-XLA sin differ at the few-ulp level for
    # angles up to ~max_position rad; 5e-5 abs is ample for RoPE tables.
    assert jnp.allclose(out, ref, atol=5e-5, rtol=1e-5), (
        "Pallas output mismatch vs reference"
    )
    print("KERNEL_OK")
</pallas_src>

<mosaic_0001>
module attributes {stable_mosaic.version = 11 : i64} {
  func.func @_rope_kernel(%arg0: i32, %arg1: memref<8x4xi32, #tpu.memory_space<vmem>>, %arg2: memref<4x128xf32, #tpu.memory_space<vmem>>, %arg3: memref<1x128xf32, #tpu.memory_space<vmem>>, %arg4: memref<8x128xf32, #tpu.memory_space<vmem>>) attributes {dimension_semantics = [#tpu.dimension_semantics<parallel>], iteration_bounds = array<i64: 1>, scalar_prefetch = 0 : i64, scratch_operands = 0 : i64, tpu.core_type = #tpu.core_type<tc>, window_params = [{transform_indices = @transform_0, window_bounds = array<i64: 8, 4>}, {pipeline_mode = #tpu.pipeline_mode<synchronous>, transform_indices = @transform_1, window_bounds = array<i64: 4, 128>}, {pipeline_mode = #tpu.pipeline_mode<synchronous>, transform_indices = @transform_2, window_bounds = array<i64: 1, 128>}, {transform_indices = @transform_3, window_bounds = array<i64: 8, 128>}]} {
    %c0 = arith.constant 0 : index
    %c0_0 = arith.constant 0 : index
    %0 = vector.load %arg1[%c0, %c0_0] : memref<8x4xi32, #tpu.memory_space<vmem>>, vector<8x4xi32>
    %1 = arith.sitofp %0 : vector<8x4xi32> to vector<8x4xf32>
    %2 = vector.extract_strided_slice %1 {offsets = [0, 0], sizes = [8, 1], strides = [1, 1]} : vector<8x4xf32> to vector<8x1xf32>
    %c0_1 = arith.constant 0 : index
    %c0_2 = arith.constant 0 : index
    %3 = vector.load %arg2[%c0_1, %c0_2] : memref<4x128xf32, #tpu.memory_space<vmem>>, vector<1x128xf32>
    %4 = vector.broadcast %2 : vector<8x1xf32> to vector<8x128xf32>
    %5 = vector.broadcast %3 : vector<1x128xf32> to vector<8x128xf32>
    %6 = arith.mulf %4, %5 : vector<8x128xf32>
    %7 = vector.extract_strided_slice %1 {offsets = [0, 1], sizes = [8, 1], strides = [1, 1]} : vector<8x4xf32> to vector<8x1xf32>
    %c1 = arith.constant 1 : index
    %c0_3 = arith.constant 0 : index
    %8 = vector.load %arg2[%c1, %c0_3] : memref<4x128xf32, #tpu.memory_space<vmem>>, vector<1x128xf32>
    %9 = vector.broadcast %7 : vector<8x1xf32> to vector<8x128xf32>
    %10 = vector.broadcast %8 : vector<1x128xf32> to vector<8x128xf32>
    %11 = arith.mulf %9, %10 : vector<8x128xf32>
    %12 = arith.addf %6, %11 : vector<8x128xf32>
    %13 = vector.extract_strided_slice %1 {offsets = [0, 2], sizes = [8, 1], strides = [1, 1]} : vector<8x4xf32> to vector<8x1xf32>
    %c2 = arith.constant 2 : index
    %c0_4 = arith.constant 0 : index
    %14 = vector.load %arg2[%c2, %c0_4] : memref<4x128xf32, #tpu.memory_space<vmem>>, vector<1x128xf32>
    %15 = vector.broadcast %13 : vector<8x1xf32> to vector<8x128xf32>
    %16 = vector.broadcast %14 : vector<1x128xf32> to vector<8x128xf32>
    %17 = arith.mulf %15, %16 : vector<8x128xf32>
    %18 = arith.addf %12, %17 : vector<8x128xf32>
    %19 = vector.extract_strided_slice %1 {offsets = [0, 3], sizes = [8, 1], strides = [1, 1]} : vector<8x4xf32> to vector<8x1xf32>
    %c3 = arith.constant 3 : index
    %c0_5 = arith.constant 0 : index
    %20 = vector.load %arg2[%c3, %c0_5] : memref<4x128xf32, #tpu.memory_space<vmem>>, vector<1x128xf32>
    %21 = vector.broadcast %19 : vector<8x1xf32> to vector<8x128xf32>
    %22 = vector.broadcast %20 : vector<1x128xf32> to vector<8x128xf32>
    %23 = arith.mulf %21, %22 : vector<8x128xf32>
    %24 = arith.addf %18, %23 : vector<8x128xf32>
    %c0_6 = arith.constant 0 : index
    %c0_7 = arith.constant 0 : index
    %25 = vector.load %arg3[%c0_6, %c0_7] : memref<1x128xf32, #tpu.memory_space<vmem>>, vector<1x128xf32>
    %26 = vector.broadcast %25 : vector<1x128xf32> to vector<8x128xf32>
    %27 = arith.addf %24, %26 : vector<8x128xf32>
    %28 = math.sin %27 : vector<8x128xf32>
    %c0_8 = arith.constant 0 : index
    %c0_9 = arith.constant 0 : index
    %29 = vector.load %arg4[%c0_8, %c0_9] : memref<8x128xf32, #tpu.memory_space<vmem>>, vector<8x128xf32>
    tpu.vector_store %arg4[%c0_8, %c0_9], %28 {strides = array<i32>} : memref<8x128xf32, #tpu.memory_space<vmem>>, vector<8x128xf32>,
    return
  }
  func.func @transform_0(%arg0: i32) -> (i32, i32) {
    %c0_i32 = arith.constant 0 : i32
    %c0_i32_0 = arith.constant 0 : i32
    return %arg0, %c0_i32 : i32, i32
  }
  func.func @transform_1(%arg0: i32) -> (i32, i32) {
    %c0_i32 = arith.constant 0 : i32
    %c0_i32_0 = arith.constant 0 : i32
    %c0_i32_1 = arith.constant 0 : i32
    return %c0_i32, %c0_i32_0 : i32, i32
  }
  func.func @transform_2(%arg0: i32) -> (i32, i32) {
    %c0_i32 = arith.constant 0 : i32
    %c0_i32_0 = arith.constant 0 : i32
    %c0_i32_1 = arith.constant 0 : i32
    return %c0_i32, %c0_i32_0 : i32, i32
  }
  func.func @transform_3(%arg0: i32) -> (i32, i32) {
    %c0_i32 = arith.constant 0 : i32
    %c0_i32_0 = arith.constant 0 : i32
    return %arg0, %c0_i32 : i32, i32
  }
}

</mosaic_0001>

<bundles_post_ra>
// kernel: tpu_custom_call.1
= control target key start
LH: loop header
LB: loop body
LE: loop exit
PB: predicated region body
PF: predicated region fallthrough
CT: control target
= control target key end

     0   :  { %8 = vsyncpa [#allocation3], 0  ;;  %s428_s0 = inlined_call_operand.hbm [shape: s32[4,4], index: 0, kind: input, shape index: {}]   ;;  %s429_s1 = inlined_call_operand.hbm [shape: f32[4,128], index: 1, kind: input, shape index: {}]   ;;  %s430_s2 = inlined_call_operand.vmem [shape: f32[1,128], index: 2, kind: input, shape index: {}]   ;;  %s431_s3 = inlined_call_operand.hbm [shape: f32[4,128], index: 3, kind: output, shape index: {}]  }
   0x1   :  { %9 = vsyncpa [#allocation6], 0 }
   0x2   :  { %10 = vsyncpa [#allocation4], 0 }
   0x3   :  { %15 = vsyncadd [#allocation3], 64  ;;  %s327_s12 = smov [#allocation2]   ;;  %s255_s16 = scalar_lea.hbm %s428_s0, 64 }
   0x4   :  { %s16_s13 = sshll.u32 %s327_s12, 4  ;;  %p256_p0 = scmp.ne.s32.totalorder %s428_s0, %s255_s16  ;;  %s17_s13 = int_to_ptr.vmem [resolvable:$true] %s16_s13 }
   0x5   :  { %p259_p1 = scmp.lt.u32.totalorder %s255_s16, %s428_s0 }
   0x7   :  { %p261_p2 = pnand %p259_p1, %p256_p0 }
   0x9   :  { %264 = shalt.err (!%p261_p2)
}
   0xa   :  { %s265_s21 = scalar_lea.vmem %s17_s13, 64  ;;  %s269_s22 = scalar_lea.vmem %s17_s13, 128 }
   0xb   :  { %p266_p3 = scmp.ne.s32.totalorder %s17_s13, %s265_s21  ;;  %p270_p4 = scmp.lt.s32.totalorder %s17_s13, %s17_s13 }
   0xc   :  { %p271_p5 = scmp.lt.s32.totalorder %s269_s22, %s265_s21 }
   0xe   :  { %p272_p6 = por %p271_p5, %p270_p4 }
  0x10   :  { %p273_p7 = pnand %p272_p6, %p266_p3 }
  0x12   :  { %276 = shalt.err (!%p273_p7)
}
  0x13   :  { %s328_s23 = smov 64   ;;  %s329_s24 = smov 4  }
  0x14   :  { %22 = dma.hbm_to_vmem [thread:$0]  %s428_s0, 64, %s17_s13, [#allocation3], %s328_s23, %s328_s23, %s329_s24  }
  0x15   :  { %s330_s27 = smov [#allocation5]   ;;  %s277_s4 = scalar_lea.hbm %s429_s1, 64 }
  0x16   :  { %s29_s28 = sshll.u32 %s330_s27, 4  ;;  %p278_p8 = scmp.ne.s32.totalorder %s429_s1, %s277_s4  ;;  %s30_s28 = int_to_ptr.vmem [resolvable:$true] %s29_s28 }
  0x17   :  { %p281_p9 = scmp.lt.u32.totalorder %s277_s4, %s429_s1 }
  0x19   :  { %p283_p10 = pnand %p281_p9, %p278_p8 }
  0x1b   :  { %286 = shalt.err (!%p283_p10)
}
  0x1c   :  { %s287_s9 = scalar_lea.vmem %s30_s28, 64  ;;  %p292_p12 = scmp.lt.s32.totalorder %s30_s28, %s30_s28 }
  0x1d   :  { %p288_p11 = scmp.ne.s32.totalorder %s30_s28, %s287_s9  ;;  %p293_p13 = scmp.lt.s32.totalorder %s287_s9, %s287_s9 }
  0x1f   :  { %p294_p0 = por %p293_p13, %p292_p12 }
  0x21   :  { %p295_p1 = pnand %p294_p0, %p288_p11 }
  0x23   :  { %298 = shalt.err (!%p295_p1)
}
  0x24   :  { %32 = dma.hbm_to_vmem [thread:$0]  %s429_s1, 64, %s30_s28, [#allocation6]  }
  0x25   :  { %321 = dma.done.wait [#allocation3], 128  }
  0x26   :  { %322 = vsyncadd [#allocation3], 4294967168 }
  0x27   :  { %323 = dma.done.wait [#allocation6], 64  }
  0x28   :  { %324 = vsyncadd [#allocation6], 4294967232  ;;  %v331_v0 = vmov 0   ;;  %v332_v1 = vmov 2   ;;  %v41_v2 = vld [vmem:[#allocation2] sm:$0xff]  ;;  %v333_v4 = vmov 1  }
  0x29   :  { %246 = vset.pattern.permute.xlu0 %v331_v0  ;;  %248 = vset.pattern.permute.xlu1 %v332_v1  ;;  %v42_v3 = vcvt.s32.f32 %v41_v2  ;;  %v334_v5 = vmov 3   ;;  %v218_v8 = vld [vmem:[#allocation5] ss:$0 sm:$0xff]  ;;  %v219_v9 = vld [vmem:[#allocation5 + $0x1] ss:$0 sm:$0xff] }
  0x2a   :  { %v220_v10 = vld [vmem:[#allocation5 + $0x2] ss:$0 sm:$0xff]  ;;  %v221_v12 = vld [vmem:[#allocation5 + $0x3] ss:$0 sm:$0xff]  ;;  %v222_v20 = vld [vmem:[%s430_s2] ss:$0 sm:$0xff] }
  0x2b   :  { %46 = vperm.xlu0 %246, %v42_v3   ;;  %67 = vperm.xlu1 %248, %v42_v3   ;;  %v335_v33 = vmov 683565275   ;;  %v336_v35 = vmov 2475754826   ;;  %v337_v38 = vmov 2131351028  }
  0x2c   :  { %v338_v41 = vmov 2102212464   ;;  %v339_v44 = vmov 920167782   ;;  %v340_v47 = vmov 1326507024  }
  0x2f   :  { %247 = vset.pattern.permute.xlu0 %v333_v4  ;;  %249 = vset.pattern.permute.xlu1 %v334_v5 }
  0x30   :  { %56 = vperm.xlu0 %247, %v42_v3   ;;  %78 = vperm.xlu1 %249, %v42_v3  }
  0x34   :  { %250 = vset.pattern.permute.xlu0 %v334_v5 }
  0xaa   :  { %v47_v6 = vpop.permute.xlu0 %46  ;;  %v68_v7 = vpop.permute.xlu1 %67 }
  0xab   :  { %v53_v14 = vmul.f32 %v218_v8, %v47_v6  ;;  %v74_v16 = vmul.f32 %v220_v10, %v68_v7 }
  0xaf   :  { %v57_v11 = vpop.permute.xlu0 %56  ;;  %v79_v13 = vpop.permute.xlu1 %78 }
  0xb0   :  { %v63_v15 = vmul.f32 %v219_v9, %v57_v11  ;;  %v85_v18 = vmul.f32 %v221_v12, %v79_v13 }
  0xb2   :  { %v64_v17 = vadd.f32 %v63_v15, %v53_v14 }
  0xb4   :  { %v75_v19 = vadd.f32 %v74_v16, %v64_v17 }
  0xb6   :  { %v86_v21 = vadd.f32 %v85_v18, %v75_v19 }
  0xb8   :  { %v392_v22 = vadd.f32 %v222_v20, %v86_v21 }
  0xba   :  { %v98_v23 = vand.u32 2139095040, %v392_v22  ;;  %v95_v27 = vand.u32 2147483647, %v392_v22  ;;  %vm97_vm7 = vcmp.lt.s32.totalorder %v392_v22, 0  ;;  %vm187_vm12 = vweird.f32 %v392_v22 }
  0xbc   :  { %v99_v24 = vshrl.u32 %v98_v23, 23  ;;  %v102_v30 = vand.u32 8388607, %v95_v27  ;;  %vm96_vm8 = vcmp.le.f32.partialorder %v95_v27, 0.7853982 }
  0xbe   :  { %v223_v25 = vadd.s32 4294967169, %v99_v24  ;;  %v103_v49 = vor.u32 8388608, %v102_v30 }
  0xc0   :  { %v105_v26 = vadd.s32 1, %v223_v25  ;;  %v143_v63 = vshll.u32 %v103_v49, 8 }
  0xc2   :  { %vm106_vm0 = vcmp.gt.s32.totalorder %v105_v26, 0 }
  0xc3   :  { %v107_v28 = vsel %vm106_vm0, %v105_v26, 0 }
  0xc4   :  { %v109_v29 = vand.u32 31, %v107_v28  ;;  %v108_v32 = vshrl.u32 %v107_v28, 5 }
  0xc6   :  { %v110_v31 = vsub.s32 32, %v109_v29  ;;  %v112_v34 = vshll.u32 %v335_v33, %v109_v29  ;;  %v115_v36 = vshll.u32 %v336_v35, %v109_v29  ;;  %v118_v40 = vshll.u32 %v337_v38, %v109_v29 }
  0xc7   :  { %v121_v43 = vshll.u32 %v338_v41, %v109_v29  ;;  %v124_v46 = vshll.u32 %v339_v44, %v109_v29  ;;  %vm127_vm1 = vcmp.lt.s32.totalorder %v108_v32, 1  ;;  %vm130_vm2 = vcmp.lt.s32.totalorder %v108_v32, 4 }
  0xc8   :  { %v113_v37 = vshrl.u32 %v336_v35, %v110_v31  ;;  %v116_v39 = vshrl.u32 %v337_v38, %v110_v31  ;;  %v119_v42 = vshrl.u32 %v338_v41, %v110_v31  ;;  %v122_v45 = vshrl.u32 %v339_v44, %v110_v31 }
  0xc9   :  { %v125_v48 = vshrl.u32 %v340_v47, %v110_v31  ;;  %v111_v58 = vshrl.u32 %v335_v33, %v110_v31  ;;  %vm129_vm3 = vcmp.lt.s32.totalorder %v108_v32, 3  ;;  %vm128_vm4 = vcmp.lt.s32.totalorder %v108_v32, 2 }
  0xca   :  { %v114_v50 = vor.u32 %v113_v37, %v112_v34  ;;  %v117_v51 = vor.u32 %v116_v39, %v115_v36  ;;  %v120_v52 = vor.u32 %v119_v42, %v118_v40  ;;  %v123_v53 = vor.u32 %v122_v45, %v121_v43 }
  0xcb   :  { %v126_v54 = vor.u32 %v125_v48, %v124_v46 }
  0xcc   :  { %v132_v55 = vsel %vm130_vm2, %v120_v52, 2102212464  ;;  %v135_v56 = vsel %vm127_vm1, %v114_v50, %v117_v51  ;;  %v139_v57 = vsel %vm127_vm1, %v117_v51, %v120_v52  ;;  %v136_v59 = vsel %vm130_vm2, %v123_v53, 920167782 }
  0xcd   :  { %v140_v60 = vsel %vm130_vm2, %v126_v54, 1326507024  ;;  %v137_v61 = vsel %vm129_vm3, %v120_v52, %v136_v59  ;;  %v131_v0 = vsel %vm127_vm1, %v111_v58, %v114_v50  ;;  %v133_v1 = vsel %vm129_vm3, %v117_v51, %v132_v55 }
  0xce   :  { %v141_v62 = vsel %vm129_vm3, %v123_v53, %v140_v60  ;;  %v138_v2 = vsel %vm128_vm4, %v135_v56, %v137_v61  ;;  %v134_v8 = vsel %vm128_vm4, %v131_v0, %v133_v1 }
  0xcf   :  { %v142_v3 = vsel %vm128_vm4, %v139_v57, %v141_v62  ;;  %v401_v6 = vmul.u32.u64.low %v143_v63, %v138_v2  ;;  %v402_v7 = vmul.u32.u64.high %v143_v63, %v138_v2, %v401_v6  ;;  %v150_v10 = vmul.u32 %v143_v63, %v134_v8 }
  0xd0   :  { %v398_v4 = vmul.u32.u64.low %v143_v63, %v142_v3  ;;  %v399_v5 = vmul.u32.u64.high %v143_v63, %v142_v3, %v398_v4 }
  0xd1   :  { %v153_v9 = vadd.s32 1, %v402_v7 }
  0xd2   :  { %vm152_vm5 = vc.u32 %v399_v5, %v401_v6  ;;  %v151_v23 = vadd.s32 %v401_v6, %v399_v5 }
  0xd3   :  { %v154_v11 = vsel %vm152_vm5, %v153_v9, %v402_v7 }
  0xd4   :  { %v155_v12 = vadd.s32 %v154_v11, %v150_v10 }
  0xd6   :  { %v156_v13 = vadd.s32 536870912, %v155_v12 }
  0xd8   :  { %v157_v14 = vshrl.u32 %v156_v13, 30 }
  0xda   :  { %v158_v15 = vshll.u32 %v157_v14, 30  ;;  %v181_v36 = vsub.s32 4, %v157_v14 }
  0xdc   :  { %v159_v16 = vsub.s32 %v155_v12, %v158_v15  ;;  %v182_v39 = vsel %vm97_vm7, %v181_v36, %v157_v14 }
  0xdd   :  { %v184_v41 = vsel %vm96_vm8, 0, %v182_v39 }
  0xde   :  { %v161_v17 = vsub.s32 0, %v159_v16  ;;  %v188_v42 = vadd.s32 3, %v184_v41 }
  0xe0   :  { %v224_v18 = vmin.u32 %v161_v17, %v159_v16  ;;  %v189_v43 = vand.u32 3, %v188_v42 }
  0xe2   :  { %v163_v19 = vclz %v224_v18  ;;  %vm194_vm9 = vcmp.eq.s32.totalorder %v189_v43, 2  ;;  %vm191_vm10 = vcmp.eq.s32.totalorder %v189_v43, 0  ;;  %vm190_vm11 = vcmp.lt.s32.totalorder %v189_v43, 2 }
  0xe4   :  { %v225_v20 = vadd.s32 4294967294, %v163_v19 }
  0xe6   :  { %vm226_vm6 = vcmp.lt.s32.totalorder %v225_v20, 0 }
  0xe7   :  { %v166_v21 = vsel %vm226_vm6, 0, %v225_v20 }
  0xe8   :  { %v167_v24 = vsub.s32 32, %v166_v21  ;;  %v171_v25 = vsub.s32 4294967266, %v166_v21  ;;  %v168_v26 = vshll.u32 %v159_v16, %v166_v21 }
  0xea   :  { %v169_v28 = vshrl.u32 %v151_v23, %v167_v24  ;;  %v172_v29 = vadd.s32 127, %v171_v25 }
  0xec   :  { %v170_v30 = vor.u32 %v169_v28, %v168_v26  ;;  %v173_v31 = vshll.u32 %v172_v29, 23 }
  0xee   :  { %v174_v32 = vor.u32 4788187, %v173_v31  ;;  %v177_v34 = vcvt.s32.f32 %v170_v30 }
  0xf0   :  { %v175_v33 = vand.u32 2147483647, %v174_v32 }
  0xf2   :  { %v178_v35 = vmul.f32 %v177_v34, %v175_v33 }
  0xf4   :  { %v179_v37 = vxor.u32 2147483648, %v178_v35 }
  0xf6   :  { %v180_v38 = vsel %vm97_vm7, %v179_v37, %v178_v35 }
  0xf7   :  { %v183_v40 = vsel %vm96_vm8, %v392_v22, %v180_v38 }
  0xf8   :  { %251 = vcosq.f32 %v183_v40 }
  0xf9   :  { %253 = vsinq.f32 %v183_v40 }
 0x102   :  { %v252_v44 = vpop.eup %251 }
 0x103   :  { %v254_v45 = vpop.eup %253  ;;  %v195_v46 = vxor.u32 2147483648, %v252_v44 }
 0x104   :  { %v192_v47 = vxor.u32 2147483648, %v254_v45 }
 0x105   :  { %v196_v48 = vsel %vm194_vm9, %v195_v46, %v254_v45 }
 0x106   :  { %v193_v49 = vsel %vm191_vm10, %v252_v44, %v192_v47 }
 0x107   :  { %v197_v27 = vsel %vm190_vm11, %v193_v49, %v196_v48 }
 0x108   :  { %v198_v50 = vsel %vm187_vm12, nan, %v197_v27 }
 0x109   :  { %199 = vst [vmem:[#allocation7] sm:$0xff] %v198_v50 }
 0x10a   :  { %204 = vsyncadd [#allocation4], 64  ;;  %s341_s2 = smov [#allocation7]  }
 0x10b   :  { %s205_s12 = sshll.u32 %s341_s2, 4  ;;  %s206_s12 = int_to_ptr.vmem [resolvable:$true] %s205_s12 }
 0x10c   :  { %s299_s13 = scalar_lea.vmem %s206_s12, 64  ;;  %s303_s14 = scalar_lea.vmem %s206_s12, 128 }
 0x10d   :  { %p300_p2 = scmp.ne.s32.totalorder %s206_s12, %s299_s13  ;;  %p304_p3 = scmp.lt.s32.totalorder %s206_s12, %s206_s12 }
 0x10e   :  { %p305_p4 = scmp.lt.s32.totalorder %s303_s14, %s299_s13 }
 0x110   :  { %p306_p5 = por %p305_p4, %p304_p3 }
 0x112   :  { %p307_p6 = pnand %p306_p5, %p300_p2 }
 0x114   :  { %310 = shalt.err (!%p307_p6)
}
 0x115   :  { %s311_s17 = scalar_lea.hbm %s431_s3, 64 }
 0x116   :  { %p312_p7 = scmp.ne.s32.totalorder %s431_s3, %s311_s17  ;;  %p315_p8 = scmp.lt.u32.totalorder %s311_s17, %s431_s3 }
 0x118   :  { %p317_p9 = pnand %p315_p8, %p312_p7 }
 0x11a   :  { %320 = shalt.err (!%p317_p9)
}
 0x11b   :  { %211 = dma.vmem_to_hbm [thread:$0]  %s206_s12, 64, %s431_s3, [#allocation4], %s328_s23, %s328_s23, %s329_s24  }
 0x11c   :  { %325 = dma.done.wait [#allocation4], 128  }
 0x11d   :  { %326 = vsyncadd [#allocation4], 4294967168 }
 0x11e   :  { %215 = vsyncpa [#allocation3], 1 }
 0x11f   :  { %216 = vsyncpa [#allocation6], 1 }
 0x120   :  { %217 = vsyncpa [#allocation4], 1 }

</bundles_post_ra>
